<compile_context>
chip_gen: v7x
topology: tpu7x:2x2x1
jax: 0.10.0
libtpu: 0.0.40
codegen_flags: <defaults>
</compile_context>

<pallas_src>
import functools
import math

import jax
import jax.numpy as jnp
from jax.experimental import pallas as pl
from jax.experimental.pallas import tpu as pltpu


def _round_up(x, m):
    return ((x + m - 1) // m) * m


def _simclr_denom_kernel(pred_ref, keys_t_ref, out_ref, *, shift):
    """Accumulate per-anchor sum_j exp(score_ij - shift) over key tiles.

    Grid: (anchor blocks [parallel], key blocks [arbitrary / reduction]).
    Keys already carry the 1/temp scale, so score_ij = cos_ij / temp and
    score_ij <= shift (= 1/temp): no running-max tracking is needed.
    The output block (same block index across the key axis) is the accumulator.
    """
    k = pl.program_id(1)

    @pl.when(k == 0)
    def _():
        out_ref[...] = jnp.zeros_like(out_ref)

    scores = jnp.dot(pred_ref[...], keys_t_ref[...],
                     preferred_element_type=jnp.float32)        # (bq, bk), f32
    out_ref[...] += jnp.sum(jnp.exp(scores - shift), axis=1, keepdims=True)


def contrastive_loss_simclr(pred, positive, temp, *, block_q=512, block_k=512,
                            matmul_dtype=jnp.bfloat16):
    """Pallas TPU implementation of ContrastiveLossSimCLR.forward. Returns scalar f32."""
    assert pred.shape == positive.shape and pred.ndim == 2
    n, d = pred.shape
    inv_temp = float(1.0 / temp)
    eps = 1e-8
    cdt = jnp.dtype(matmul_dtype)

    # ---- wrapper-side O(N*D) work: row L2 normalization (f32), positive term --
    # TODO(synk): torch.nn.CosineSimilarity clamps the norm *product*; here each
    # row norm is clamped separately (only differs for near-zero-norm rows).
    p32 = pred.astype(jnp.float32)
    q32 = positive.astype(jnp.float32)
    p_n = p32 / jnp.maximum(jnp.sqrt(jnp.sum(p32 * p32, axis=1, keepdims=True)), eps)
    q_n = q32 / jnp.maximum(jnp.sqrt(jnp.sum(q32 * q32, axis=1, keepdims=True)), eps)

    s_pos = jnp.sum(p_n * q_n, axis=1)                           # cos(p_i, q_i), f32

    # ---- tiling ---------------------------------------------------------------
    block_q = max(8, _round_up(block_q, 8))
    block_k = max(128, _round_up(block_k, 128))
    n_keys = 2 * n

    if n >= 2 * block_q:
        bq = block_q
    else:
        # shrink the anchor tile so there are >= 2 parallel blocks (megacore)
        bq = min(block_q, max(8, _round_up(-(-n // 2), 8)))
    nq_pad = _round_up(n, bq)

    bk = min(block_k, _round_up(n_keys, 128))
    nk_pad = _round_up(n_keys, bk)

    # ---- kernel inputs --------------------------------------------------------
    # Fused key set [pred_n ; pos_n], scaled by 1/temp and pre-transposed so the
    # kernel contraction is (bq, D) @ (D, bk) with the 2N key axis on lanes.
    keys = jnp.concatenate([p_n, q_n], axis=0) * inv_temp        # (2N, D), f32
    pred_in = jnp.pad(p_n, ((0, nq_pad - n), (0, 0))).astype(cdt)        # (nq_pad, D)
    keys_in = jnp.pad(keys.T, ((0, 0), (0, nk_pad - n_keys))).astype(cdt)  # (D, nk_pad)

    # Self term (j == i over pred), computed through the matmul dtype so it
    # matches the MXU diagonal and the subtraction below stays consistent.
    s_self = jnp.sum(pred_in[:n].astype(jnp.float32) *
                     keys_in[:, :n].T.astype(jnp.float32), axis=1)   # = cos_ii/temp

    # ---- pallas call ----------------------------------------------------------
    grid = (nq_pad // bq, nk_pad // bk)
    kernel = functools.partial(_simclr_denom_kernel, shift=inv_temp)

    # Double-buffered input tiles + f32 score intermediates, capped with
    # headroom under v7x's 64 MiB physical VMEM (fits easily on v5e/v6e).
    est = 2 * (bq * d + d * bk) * cdt.itemsize + 2 * bq * 4 + 3 * bq * bk * 4
    vmem_limit = int(min(max(2 * est, 16 * 1024 * 1024), 48 * 1024 * 1024))

    l = pl.pallas_call(
        kernel,
        out_shape=jax.ShapeDtypeStruct((nq_pad, 1), jnp.float32),
        grid_spec=pltpu.PrefetchScalarGridSpec(
            num_scalar_prefetch=0,
            grid=grid,
            in_specs=[
                pl.BlockSpec((bq, d), lambda i, k: (i, 0)),   # anchors (pred_n)
                pl.BlockSpec((d, bk), lambda i, k: (0, k)),   # fused keys (D, 2N)
            ],
            out_specs=pl.BlockSpec((bq, 1), lambda i, k: (i, 0)),
        ),
        compiler_params=pltpu.CompilerParams(
            dimension_semantics=("parallel", "arbitrary"),
            vmem_limit_bytes=vmem_limit),
    )(pred_in, keys_in)

    l = l[:n, 0]                                                 # drop padded anchors

    # Zero-padded key columns each contributed exactly exp(-1/temp); the dropped
    # self term is exp(s_self - 1/temp).  Clamp guards bf16 cancellation.
    pad_corr = (nk_pad - n_keys) * math.exp(-inv_temp)
    l_corr = l - pad_corr - jnp.exp(s_self - inv_temp)
    log_denom = inv_temp + jnp.log(jnp.maximum(l_corr, 1e-30))

    loss = log_denom - s_pos * inv_temp
    return jnp.mean(loss)


def _reference(pred, positive, temp):
    """Pure-JAX reference mirroring the PyTorch double loop (vectorized, f32)."""
    eps = 1e-8
    p = pred / jnp.maximum(jnp.linalg.norm(pred, axis=1, keepdims=True), eps)
    q = positive / jnp.maximum(jnp.linalg.norm(positive, axis=1, keepdims=True), eps)
    e_pp = jnp.exp((p @ p.T) / temp)
    e_pq = jnp.exp((p @ q.T) / temp)
    pos = jnp.diag(e_pq)
    denom = e_pp.sum(1) - jnp.diag(e_pp) + e_pq.sum(1)
    return jnp.mean(-jnp.log(pos / denom))


if __name__ == "__main__":
    key = jax.random.PRNGKey(0)
    k1, k2, k3, k4 = jax.random.split(key, 4)
    temp = 0.5

    # Case 1: small shapes implied by the module (8 anchors, 32-dim features).
    n1, d1 = 8, 32
    pred1 = jax.random.normal(k1, (n1, d1), dtype=jnp.float32)
    pos1 = jax.random.normal(k2, (n1, d1), dtype=jnp.float32)
    ref1 = _reference(pred1, pos1, temp)

    out_f32 = jax.block_until_ready(
        contrastive_loss_simclr(pred1, pos1, temp, matmul_dtype=jnp.float32))
    assert jnp.allclose(out_f32, ref1, rtol=1e-4, atol=1e-5), (out_f32, ref1)

    out_bf16 = jax.block_until_ready(
        contrastive_loss_simclr(pred1, pos1, temp))        # default bf16 MXU path
    assert jnp.allclose(out_bf16, ref1, rtol=2e-2, atol=2e-2), (out_bf16, ref1)

    # Case 2: exercises the multi-tile grid (3 anchor blocks x 2 key blocks),
    # cross-key-tile accumulation and the analytic key-padding correction.
    n2, d2 = 90, 32
    pred2 = jax.random.normal(k3, (n2, d2), dtype=jnp.float32)
    pos2 = jax.random.normal(k4, (n2, d2), dtype=jnp.float32)
    ref2 = _reference(pred2, pos2, temp)
    out2 = jax.block_until_ready(
        contrastive_loss_simclr(pred2, pos2, temp, block_q=32, block_k=128,
                                matmul_dtype=jnp.float32))
    assert jnp.allclose(out2, ref2, rtol=1e-4, atol=1e-5), (out2, ref2)

    print("KERNEL_OK")
</pallas_src>

<mosaic_0001>
module attributes {stable_mosaic.version = 11 : i64} {
  func.func @_simclr_denom_kernel(%arg0: i32, %arg1: i32, %arg2: memref<8x32xf32, #tpu.memory_space<vmem>>, %arg3: memref<32x128xf32, #tpu.memory_space<vmem>>, %arg4: memref<8x1xf32, #tpu.memory_space<vmem>>) attributes {dimension_semantics = [#tpu.dimension_semantics<parallel>, #tpu.dimension_semantics<arbitrary>], iteration_bounds = array<i64: 1, 1>, scalar_prefetch = 0 : i64, scratch_operands = 0 : i64, tpu.core_type = #tpu.core_type<tc>, window_params = [{transform_indices = @transform_0, window_bounds = array<i64: 8, 32>}, {transform_indices = @transform_1, window_bounds = array<i64: 32, 128>}, {transform_indices = @transform_2, window_bounds = array<i64: 8, 1>}]} {
    %c0_i32 = arith.constant 0 : i32
    %0 = arith.cmpi eq, %arg1, %c0_i32 : i32
    %1 = arith.extui %0 : i1 to i32
    %c0_i32_0 = arith.constant 0 : i32
    %2 = arith.cmpi ne, %1, %c0_i32_0 : i32
    scf.if %2 {
      %cst_10 = arith.constant 0.000000e+00 : f32
      %14 = vector.broadcast %cst_10 : f32 to vector<8x1xf32>
      %c0_11 = arith.constant 0 : index
      %c0_12 = arith.constant 0 : index
      %15 = vector.load %arg4[%c0_11, %c0_12] : memref<8x1xf32, #tpu.memory_space<vmem>>, vector<8x1xf32>
      tpu.vector_store %arg4[%c0_11, %c0_12], %14 {strides = array<i32>} : memref<8x1xf32, #tpu.memory_space<vmem>>, vector<8x1xf32>,
    } else {
    }
    %c0 = arith.constant 0 : index
    %c0_1 = arith.constant 0 : index
    %3 = vector.load %arg2[%c0, %c0_1] : memref<8x32xf32, #tpu.memory_space<vmem>>, vector<8x32xf32>
    %c0_2 = arith.constant 0 : index
    %c0_3 = arith.constant 0 : index
    %4 = vector.load %arg3[%c0_2, %c0_3] : memref<32x128xf32, #tpu.memory_space<vmem>>, vector<32x128xf32>
    %cst = arith.constant dense<0.000000e+00> : vector<8x128xf32>
    %5 = tpu.matmul %3, %4, %cst {dimension_numbers = #tpu.dot_dimension_numbers<[1], [0], [0], [1], [0, 0, 1, 1], [], []>} : vector<8x32xf32>, vector<32x128xf32>, vector<8x128xf32> -> vector<8x128xf32>
    %c0_4 = arith.constant 0 : index
    %c0_5 = arith.constant 0 : index
    %6 = vector.load %arg4[%c0_4, %c0_5] : memref<8x1xf32, #tpu.memory_space<vmem>>, vector<8x1xf32>
    %cst_6 = arith.constant 2.000000e+00 : f32
    %7 = vector.broadcast %cst_6 : f32 to vector<8x128xf32>
    %8 = arith.subf %5, %7 : vector<8x128xf32>
    %9 = math.exp %8 : vector<8x128xf32>
    %cst_7 = arith.constant dense<0.000000e+00> : vector<8xf32>
    %10 = vector.multi_reduction <add>, %9, %cst_7 [1] : vector<8x128xf32> to vector<8xf32>
    %11 = vector.shape_cast %10 : vector<8xf32> to vector<8x1xf32>
    %12 = arith.addf %6, %11 : vector<8x1xf32>
    %c0_8 = arith.constant 0 : index
    %c0_9 = arith.constant 0 : index
    %13 = vector.load %arg4[%c0_8, %c0_9] : memref<8x1xf32, #tpu.memory_space<vmem>>, vector<8x1xf32>
    tpu.vector_store %arg4[%c0_8, %c0_9], %12 {strides = array<i32>} : memref<8x1xf32, #tpu.memory_space<vmem>>, vector<8x1xf32>,
    return
  }
  func.func @transform_0(%arg0: i32, %arg1: i32) -> (i32, i32) {
    %c0_i32 = arith.constant 0 : i32
    %c0_i32_0 = arith.constant 0 : i32
    return %arg0, %c0_i32 : i32, i32
  }
  func.func @transform_1(%arg0: i32, %arg1: i32) -> (i32, i32) {
    %c0_i32 = arith.constant 0 : i32
    %c0_i32_0 = arith.constant 0 : i32
    return %c0_i32, %arg1 : i32, i32
  }
  func.func @transform_2(%arg0: i32, %arg1: i32) -> (i32, i32) {
    %c0_i32 = arith.constant 0 : i32
    %c0_i32_0 = arith.constant 0 : i32
    return %arg0, %c0_i32 : i32, i32
  }
}

</mosaic_0001>

<bundles_post_ra>
// kernel: tpu_custom_call.1
= control target key start
LH: loop header
LB: loop body
LE: loop exit
PB: predicated region body
PF: predicated region fallthrough
CT: control target
= control target key end

     0   :  { %7 = vsyncpa [#allocation3], 0  ;;  %s282_s0 = inlined_call_operand.hbm [shape: f32[8,32], index: 0, kind: input, shape index: {}]   ;;  %s283_s1 = inlined_call_operand.hbm [shape: f32[32,128], index: 1, kind: input, shape index: {}]   ;;  %s284_s2 = inlined_call_operand.vmem [shape: f32[8,1], index: 2, kind: output, shape index: {}]  }
   0x1   :  { %8 = vsyncpa [#allocation5], 0  ;;  %s218_s9 = smov [#allocation2]   ;;  %s219_s11 = smov [#allocation4]  }
   0x2   :  { %s15_s10 = sshll.u32 %s218_s9, 4  ;;  %s24_s12 = sshll.u32 %s219_s11, 4  ;;  %s16_s10 = int_to_ptr.vmem [resolvable:$true] %s15_s10  ;;  %s240_s12 = int_to_ptr.vmem [resolvable:$true] %s24_s12 }
   0x3   :  { %s170_s15 = scalar_lea.hbm %s282_s0, 128 }
   0x4   :  { %p171_p0 = scmp.ne.s32.totalorder %s282_s0, %s170_s15  ;;  %p174_p1 = scmp.lt.u32.totalorder %s170_s15, %s282_s0 }
   0x6   :  { %p176_p2 = pnand %p174_p1, %p171_p0 }
   0x8   :  { %179 = shalt.err (!%p176_p2)
}
   0x9   :  { %s180_s20 = scalar_lea.vmem %s16_s10, 128  ;;  %p185_p4 = scmp.lt.s32.totalorder %s16_s10, %s16_s10 }
   0xa   :  { %p181_p3 = scmp.ne.s32.totalorder %s16_s10, %s180_s20  ;;  %p186_p5 = scmp.lt.s32.totalorder %s180_s20, %s180_s20 }
   0xc   :  { %p187_p6 = por %p186_p5, %p185_p4 }
   0xe   :  { %p188_p7 = pnand %p187_p6, %p181_p3 }
  0x10   :  { %191 = shalt.err (!%p188_p7)
}
  0x11   :  { %18 = dma.hbm_to_vmem [thread:$0]  %s282_s0, 128, %s16_s10, [#allocation3]  }
  0x12   :  { %s192_s25 = scalar_lea.hbm %s283_s1, 512 }
  0x13   :  { %p193_p8 = scmp.ne.s32.totalorder %s283_s1, %s192_s25  ;;  %p196_p9 = scmp.lt.u32.totalorder %s192_s25, %s283_s1 }
  0x15   :  { %p198_p10 = pnand %p196_p9, %p193_p8 }
  0x17   :  { %201 = shalt.err (!%p198_p10)
}
  0x18   :  { %s202_s30 = scalar_lea.vmem %s240_s12, 512  ;;  %p207_p12 = scmp.lt.s32.totalorder %s240_s12, %s240_s12 }
  0x19   :  { %p203_p11 = scmp.ne.s32.totalorder %s240_s12, %s202_s30  ;;  %p208_p13 = scmp.lt.s32.totalorder %s202_s30, %s202_s30 }
  0x1b   :  { %p209_p0 = por %p208_p13, %p207_p12 }
  0x1d   :  { %p210_p1 = pnand %p209_p0, %p203_p11 }
  0x1f   :  { %213 = shalt.err (!%p210_p1)
}
  0x20   :  { %s220_s0 = smov 128   ;;  %s221_s3 = smov 8  }
  0x21   :  { %30 = dma.hbm_to_vmem [thread:$0]  %s283_s1, 512, %s240_s12, [#allocation5], %s220_s0, %s220_s0, %s221_s3  }
  0x22   :  { %214 = dma.done.wait [#allocation3], 128  }
  0x23   :  { %215 = vsyncadd [#allocation3], 4294967168 }
  0x24   :  { %216 = dma.done.wait [#allocation5], 512  }
  0x25   :  { %217 = vsyncadd [#allocation5], 4294966784  ;;  %vm41_vm0 = vcmask 7168   ;;  %v222_v0 = vmov 0.0|0.0   ;;  %v223_v1 = vmov 0.0   ;;  %vm224_vm1 = vmmov 0  }
  0x26   :  { %155 = vmatprep.subr.bf16.mxu0 %v222_v0  ;;  %42 = vst.msk [vmem:[%s284_s2] sm:$0xff] %vm41_vm0, %v223_v1  ;;  %152 = vmatprep.mubr.msk.f32.mxu0 %vm224_vm1, %v223_v1  ;;  %v44_v2 = vld [vmem:[#allocation4] sm:$0xff]  ;;  %v45_v3 = vld [vmem:[#allocation4 + $0x8] sm:$0xff]  ;;  %v46_v4 = vld [vmem:[#allocation4 + $0x10] sm:$0xff]  ;;  %vm48_vm2 = vcmask 261120  }
  0x27   :  { %v156_v5 = vpack.c.bf16 %v45_v3, %v44_v2  ;;  %v47_v6 = vld [vmem:[#allocation4 + $0x18] sm:$0xff] }
  0x28   :  { %v159_v7 = vpack.c.bf16 %v47_v6, %v46_v4  ;;  %v43_v8 = vld [vmem:[#allocation2] sm:$0xff] }
  0x29   :  { %157 = vmatpush3.bf16.msra.mxu0 %v156_v5 }
  0x2a   :  { %158 = vmatprep.subr.bf16.mxu0 %v222_v0 }
  0x2d   :  { %160 = vmatpush3.bf16.msra.mxu0 %v159_v7  ;;  %v122_v14 = vld [vmem:[%s284_s2] sm:$0xff] }
  0x30   :  { %153 = vmatmul.mubr.msk.f32.vlgmr.msra.gmra.mrb[0].mxu0 %vm48_vm2, %v43_v8 }
 0x103   :  { %v118_v9 = vpop.f32.mrb[0].mxu0 }
 0x104   :  { %v138_v10 = vadd.f32 -2.0, %v118_v9  ;;  %v154_v11 = vpop.f32.mrb[1].mxu0 }
 0x106   :  { %v124_v12 = vmul.f32 1.442695, %v138_v10 }
 0x108   :  { %168 = vpow2.f32 %v124_v12 }
 0x112   :  { %v169_v13 = vpop.eup %168 }
 0x113   :  { %126 = vadd.xlane.f32.xlu0 %v169_v13 }
 0x1a0   :  { %v127_v15 = vpop.xlane.xlu0 %126 }
 0x1a1   :  { %v128_v16 = vadd.f32 %v127_v15, %v122_v14 }
 0x1a3   :  { %130 = vst.msk [vmem:[%s284_s2] sm:$0xff] %vm41_vm0, %v128_v16 }
 0x1a4   :  { %135 = vsyncpa [#allocation3], 1 }
 0x1a5   :  { %136 = vsyncpa [#allocation5], 1 }

</bundles_post_ra>
